<compile_context>
chip_gen: v6e
topology: v6e:2x2x1
jax: 0.10.0
libtpu: 0.0.40
codegen_flags: <defaults>
</compile_context>

<pallas_src>
import math
import functools

import jax
import jax.numpy as jnp
from jax.experimental import pallas as pl
from jax.experimental.pallas import tpu as pltpu


_MASK_VALUE = -1e30  # finite "neg-inf": avoids exp(-inf - -inf) NaNs in bf16/f32


# ----------------------------------------------------------------------------
# block-size helpers (always legal w.r.t. the (8, 128) BlockSpec rule)
# ----------------------------------------------------------------------------

def _row_block(dim, target=256):
    """Block size used on second-to-last dims: full extent or multiple of 8."""
    if dim <= target:
        return dim
    for t in (256, 128, 64, 32, 16, 8):
        if dim % t == 0:
            return t
    return dim


def _kv_block(dim):
    """Block size also used as a last (lane) dim: full extent or mult. of 128."""
    if dim <= 128:
        return dim
    for t in (512, 384, 256, 128):
        if dim % t == 0:
            return t
    return dim


# ----------------------------------------------------------------------------
# Kernel 1: per-head input projection   y[n, h, t, :] = x[n, t, :] @ W[h] + b[h]
# ----------------------------------------------------------------------------

def _head_proj_kernel(x_ref, w_ref, b_ref, o_ref):
    # x: (1, tm, d_model), w: (1, d_model, d_k), b: (1, 1, d_k)
    y = jnp.dot(x_ref[0], w_ref[0], preferred_element_type=jnp.float32)
    o_ref[0, 0] = (y + b_ref[0]).astype(o_ref.dtype)


def pallas_head_projection(x, w, b):
    """x: (N, T, d_model), w: (H, d_model, d_k), b: (H, 1, d_k) -> (N, H, T, d_k)."""
    N, T, d_model = x.shape
    H, _, d_k = w.shape
    tm = _row_block(T)
    grid = (N, T // tm, H)  # h innermost -> x block reused (no re-DMA) across heads
    return pl.pallas_call(
        _head_proj_kernel,
        out_shape=jax.ShapeDtypeStruct((N, H, T, d_k), x.dtype),
        grid=grid,
        in_specs=[
            pl.BlockSpec((1, tm, d_model), lambda n, t, h: (n, t, 0)),
            pl.BlockSpec((1, d_model, d_k), lambda n, t, h: (h, 0, 0)),
            pl.BlockSpec((1, 1, d_k), lambda n, t, h: (h, 0, 0)),
        ],
        out_specs=pl.BlockSpec((1, 1, tm, d_k), lambda n, t, h: (n, h, t, 0)),
        compiler_params=pltpu.CompilerParams(
            dimension_semantics=("parallel", "parallel", "arbitrary")),
    )(x, w, b)


# ----------------------------------------------------------------------------
# Kernel 2: flash attention (online softmax over KV tiles, in-kernel mask)
# ----------------------------------------------------------------------------

def _flash_attn_kernel(q_ref, k_ref, v_ref, kmask_ref, o_ref,
                       m_sc, l_sc, acc_sc, *, scale, causal, tq, tk):
    qi = pl.program_id(2)
    ki = pl.program_id(3)

    @pl.when(ki == 0)
    def _init():
        m_sc[...] = jnp.full(m_sc.shape, _MASK_VALUE, m_sc.dtype)
        l_sc[...] = jnp.zeros(l_sc.shape, l_sc.dtype)
        acc_sc[...] = jnp.zeros(acc_sc.shape, acc_sc.dtype)

    q = q_ref[0, 0]          # (tq, d_k)
    k = k_ref[0, 0]          # (tk, d_k)
    v = v_ref[0, 0]          # (tk, d_k)

    # q @ k^T, contracting the last dims directly (no explicit transpose of K).
    s = jax.lax.dot_general(
        q, k, dimension_numbers=(((1,), (1,)), ((), ())),
        preferred_element_type=jnp.float32) * scale          # (tq, tk) f32

    # mask generated in-kernel: key padding (per-column) + optional causal.
    keep = kmask_ref[0] > 0                                   # (1, tk) bool
    if causal:
        row = qi * tq + jax.lax.broadcasted_iota(jnp.int32, (tq, tk), 0)
        col = ki * tk + jax.lax.broadcasted_iota(jnp.int32, (tq, tk), 1)
        keep = keep & (col <= row)                            # (tq, tk)
    s = jnp.where(keep, s, _MASK_VALUE)

    # online softmax update (all stats in f32)
    m_prev = m_sc[...]                                        # (tq, 1)
    m_cur = jnp.max(s, axis=-1, keepdims=True)
    m_new = jnp.maximum(m_prev, m_cur)
    alpha = jnp.exp(m_prev - m_new)
    p = jnp.exp(s - m_new)                                    # (tq, tk)

    l_sc[...] = alpha * l_sc[...] + jnp.sum(p, axis=-1, keepdims=True)
    acc_sc[...] = alpha * acc_sc[...] + jnp.dot(
        p.astype(v.dtype), v, preferred_element_type=jnp.float32)
    m_sc[...] = m_new

    @pl.when(ki == pl.num_programs(3) - 1)
    def _finalize():
        inv_l = pl.reciprocal(l_sc[...], approx=False)
        o_ref[0, 0] = (acc_sc[...] * inv_l).astype(o_ref.dtype)


def pallas_flash_attention(q, k, v, key_mask, *, scale, causal):
    """q: (N,H,T_q,d_k), k/v: (N,H,T_k,d_k), key_mask: (N,1,T_k) int32 keep-mask."""
    N, H, T_q, d_k = q.shape
    T_k = k.shape[2]
    tq = _row_block(T_q)
    tk = _kv_block(T_k)
    kernel = functools.partial(_flash_attn_kernel, scale=scale, causal=causal,
                               tq=tq, tk=tk)
    grid = (N, H, T_q // tq, T_k // tk)
    return pl.pallas_call(
        kernel,
        out_shape=jax.ShapeDtypeStruct((N, H, T_q, d_k), q.dtype),
        grid=grid,
        in_specs=[
            pl.BlockSpec((1, 1, tq, d_k), lambda n, h, qi, ki: (n, h, qi, 0)),
            pl.BlockSpec((1, 1, tk, d_k), lambda n, h, qi, ki: (n, h, ki, 0)),
            pl.BlockSpec((1, 1, tk, d_k), lambda n, h, qi, ki: (n, h, ki, 0)),
            pl.BlockSpec((1, 1, tk), lambda n, h, qi, ki: (n, 0, ki)),
        ],
        out_specs=pl.BlockSpec((1, 1, tq, d_k), lambda n, h, qi, ki: (n, h, qi, 0)),
        scratch_shapes=[
            pltpu.VMEM((tq, 1), jnp.float32),     # running max  m
            pltpu.VMEM((tq, 1), jnp.float32),     # running sum  l
            pltpu.VMEM((tq, d_k), jnp.float32),   # accumulator
        ],
        compiler_params=pltpu.CompilerParams(
            dimension_semantics=("parallel", "parallel", "parallel", "arbitrary"),
            vmem_limit_bytes=32 * 1024 * 1024),
    )(q, k, v, key_mask)


# ----------------------------------------------------------------------------
# Kernel 3: output projection, reducing over heads   out = sum_h attn[h] @ Wo[h] + b
# ----------------------------------------------------------------------------

def _out_proj_kernel(a_ref, w_ref, b_ref, o_ref, acc_ref):
    h = pl.program_id(2)

    @pl.when(h == 0)
    def _init():
        acc_ref[...] = jnp.zeros(acc_ref.shape, acc_ref.dtype)

    acc_ref[...] += jnp.dot(a_ref[0, 0], w_ref[0],
                            preferred_element_type=jnp.float32)

    @pl.when(h == pl.num_programs(2) - 1)
    def _finalize():
        o_ref[0] = (acc_ref[...] + b_ref[...]).astype(o_ref.dtype)


def pallas_out_projection(attn, w, b):
    """attn: (N, H, T, d_k), w: (H, d_k, d_model), b: (1, d_model) -> (N, T, d_model)."""
    N, H, T, d_k = attn.shape
    d_model = w.shape[-1]
    tm = _row_block(T)
    grid = (N, T // tm, H)  # head axis is the reduction
    return pl.pallas_call(
        _out_proj_kernel,
        out_shape=jax.ShapeDtypeStruct((N, T, d_model), attn.dtype),
        grid=grid,
        in_specs=[
            pl.BlockSpec((1, 1, tm, d_k), lambda n, t, h: (n, h, t, 0)),
            pl.BlockSpec((1, d_k, d_model), lambda n, t, h: (h, 0, 0)),
            pl.BlockSpec((1, d_model), lambda n, t, h: (0, 0)),
        ],
        out_specs=pl.BlockSpec((1, tm, d_model), lambda n, t, h: (n, t, 0)),
        scratch_shapes=[pltpu.VMEM((tm, d_model), jnp.float32)],
        compiler_params=pltpu.CompilerParams(
            dimension_semantics=("parallel", "parallel", "arbitrary")),
    )(attn, w, b)


# ----------------------------------------------------------------------------
# Module wrapper (parameters stored in per-head layout; no HBM transposes)
# ----------------------------------------------------------------------------

class MultiHeadAttention:
    def __init__(self, d_k, d_model, n_heads, max_len, causal=False, key=None):
        self.d_k = d_k
        self.d_model = d_model
        self.n_heads = n_heads
        self.max_len = max_len
        self.causal = causal
        if key is None:
            key = jax.random.PRNGKey(0)
        keys = jax.random.split(key, 8)

        def init_linear(kw, kb, fan_in, fan_out):
            # PyTorch nn.Linear default: U(-1/sqrt(fan_in), 1/sqrt(fan_in));
            # weight stored already transposed to (fan_in, fan_out) for x @ W.
            bound = 1.0 / math.sqrt(fan_in)
            w = jax.random.uniform(kw, (fan_in, fan_out), jnp.float32,
                                   -bound, bound)
            b = jax.random.uniform(kb, (fan_out,), jnp.float32, -bound, bound)
            return w, b

        H, d_hid = n_heads, d_k * n_heads
        wq, bq = init_linear(keys[0], keys[1], d_model, d_hid)
        wk, bk = init_linear(keys[2], keys[3], d_model, d_hid)
        wv, bv = init_linear(keys[4], keys[5], d_model, d_hid)
        wo, bo = init_linear(keys[6], keys[7], d_hid, d_model)

        # per-head parameter layouts (one-time, tiny host-side reshapes)
        self.wq = wq.reshape(d_model, H, d_k).transpose(1, 0, 2)  # (H, d_model, d_k)
        self.wk = wk.reshape(d_model, H, d_k).transpose(1, 0, 2)
        self.wv = wv.reshape(d_model, H, d_k).transpose(1, 0, 2)
        self.bq = bq.reshape(H, 1, d_k)
        self.bk = bk.reshape(H, 1, d_k)
        self.bv = bv.reshape(H, 1, d_k)
        self.wo = wo.reshape(H, d_k, d_model)                     # (H, d_k, d_model)
        self.bo = bo.reshape(1, d_model)

    def __call__(self, q, k, v, pad_mask=None):
        N, T_q, _ = q.shape
        _, T_k, _ = k.shape

        # projections -> per-head (N, H, T, d_k) layout, written directly by
        # the out BlockSpec (no HBM transpose).
        # Note: q/k/v are distinct module inputs (cross-attention capable), so
        # the three projections are not fused into one matmul.
        qp = pallas_head_projection(q, self.wq, self.bq)
        kp = pallas_head_projection(k, self.wk, self.bk)
        vp = pallas_head_projection(v, self.wv, self.bv)

        # (N, 1, T_k) key keep-mask (int32); causal part is built in-kernel.
        if pad_mask is None:
            key_mask = jnp.ones((N, 1, T_k), dtype=jnp.int32)
        else:
            key_mask = pad_mask.reshape(N, 1, T_k).astype(jnp.int32)

        scale = 1.0 / math.sqrt(self.d_k)   # flash-attn default softmax scale
        attn = pallas_flash_attention(qp, kp, vp, key_mask,
                                      scale=scale, causal=self.causal)

        return pallas_out_projection(attn, self.wo, self.bo)


# ----------------------------------------------------------------------------
# Pure-JAX reference for a silent correctness check
# ----------------------------------------------------------------------------

def _reference(mha, q, k, v, pad_mask=None):
    N, T_q, _ = q.shape
    T_k = k.shape[1]
    qp = jnp.einsum('ntm,hmd->nhtd', q, mha.wq) + mha.bq[None]
    kp = jnp.einsum('ntm,hmd->nhtd', k, mha.wk) + mha.bk[None]
    vp = jnp.einsum('ntm,hmd->nhtd', v, mha.wv) + mha.bv[None]
    s = jnp.einsum('nhqd,nhkd->nhqk', qp, kp) / math.sqrt(mha.d_k)
    keep = jnp.ones((N, 1, T_q, T_k), dtype=bool)
    if pad_mask is not None:
        keep = keep & pad_mask[:, None, None, :]
    if mha.causal:
        keep = keep & jnp.tril(jnp.ones((T_q, T_k), dtype=bool))[None, None]
    s = jnp.where(keep, s, _MASK_VALUE)
    p = jax.nn.softmax(s, axis=-1)
    o = jnp.einsum('nhqk,nhkd->nhqd', p, vp)
    return jnp.einsum('nhtd,hdm->ntm', o, mha.wo) + mha.bo


if __name__ == "__main__":
    # small shapes: N=2, seq T=8, d_model=32, n_heads=4, d_k=8
    N, T, d_model, n_heads, d_k = 2, 8, 32, 4, 8
    key = jax.random.PRNGKey(0)
    kq, kk, kv, kp1, kp2 = jax.random.split(key, 5)

    q = jax.random.normal(kq, (N, T, d_model), dtype=jnp.float32)
    k = jax.random.normal(kk, (N, T, d_model), dtype=jnp.float32)
    v = jax.random.normal(kv, (N, T, d_model), dtype=jnp.float32)

    # (1) bidirectional, no padding
    mha = MultiHeadAttention(d_k=d_k, d_model=d_model, n_heads=n_heads,
                             max_len=T, causal=False, key=kp1)
    out = jax.block_until_ready(mha(q, k, v, pad_mask=None))
    ref = _reference(mha, q, k, v, pad_mask=None)
    assert out.shape == (N, T, d_model)
    assert jnp.allclose(out, ref, atol=2e-4, rtol=2e-4), \
        float(jnp.max(jnp.abs(out - ref)))

    # (2) causal + key padding
    mha_c = MultiHeadAttention(d_k=d_k, d_model=d_model, n_heads=n_heads,
                               max_len=T, causal=True, key=kp2)
    pad = jnp.array([[True] * T,
                     [True] * (T - 3) + [False] * 3])
    out_c = jax.block_until_ready(mha_c(q, k, v, pad_mask=pad))
    ref_c = _reference(mha_c, q, k, v, pad_mask=pad)
    assert jnp.allclose(out_c, ref_c, atol=2e-4, rtol=2e-4), \
        float(jnp.max(jnp.abs(out_c - ref_c)))

    print("KERNEL_OK")
</pallas_src>

<mosaic_0001>
module attributes {stable_mosaic.version = 11 : i64} {
  func.func @_head_proj_kernel(%arg0: i32, %arg1: i32, %arg2: i32, %arg3: memref<1x8x32xf32, #tpu.memory_space<vmem>>, %arg4: memref<1x32x8xf32, #tpu.memory_space<vmem>>, %arg5: memref<1x1x8xf32, #tpu.memory_space<vmem>>, %arg6: memref<1x1x8x8xf32, #tpu.memory_space<vmem>>) attributes {dimension_semantics = [#tpu.dimension_semantics<parallel>, #tpu.dimension_semantics<parallel>, #tpu.dimension_semantics<arbitrary>], iteration_bounds = array<i64: 2, 1, 4>, scalar_prefetch = 0 : i64, scratch_operands = 0 : i64, tpu.core_type = #tpu.core_type<tc>, window_params = [{transform_indices = @transform_0, window_bounds = array<i64: 1, 8, 32>}, {transform_indices = @transform_1, window_bounds = array<i64: 1, 32, 8>}, {transform_indices = @transform_2, window_bounds = array<i64: 1, 1, 8>}, {transform_indices = @transform_3, window_bounds = array<i64: 1, 1, 8, 8>}]} {
    %c0 = arith.constant 0 : index
    %c0_0 = arith.constant 0 : index
    %c0_1 = arith.constant 0 : index
    %0 = vector.load %arg3[%c0, %c0_0, %c0_1] : memref<1x8x32xf32, #tpu.memory_space<vmem>>, vector<1x8x32xf32>
    %1 = vector.shape_cast %0 : vector<1x8x32xf32> to vector<8x32xf32>
    %c0_2 = arith.constant 0 : index
    %c0_3 = arith.constant 0 : index
    %c0_4 = arith.constant 0 : index
    %2 = vector.load %arg4[%c0_2, %c0_3, %c0_4] : memref<1x32x8xf32, #tpu.memory_space<vmem>>, vector<1x32x8xf32>
    %3 = vector.shape_cast %2 : vector<1x32x8xf32> to vector<32x8xf32>
    %cst = arith.constant dense<0.000000e+00> : vector<8x8xf32>
    %4 = tpu.matmul %1, %3, %cst {dimension_numbers = #tpu.dot_dimension_numbers<[1], [0], [0], [1], [0, 0, 1, 1], [], []>} : vector<8x32xf32>, vector<32x8xf32>, vector<8x8xf32> -> vector<8x8xf32>
    %c0_5 = arith.constant 0 : index
    %c0_6 = arith.constant 0 : index
    %c0_7 = arith.constant 0 : index
    %5 = vector.load %arg5[%c0_5, %c0_6, %c0_7] : memref<1x1x8xf32, #tpu.memory_space<vmem>>, vector<1x1x8xf32>
    %6 = vector.shape_cast %5 : vector<1x1x8xf32> to vector<1x8xf32>
    %7 = vector.broadcast %6 : vector<1x8xf32> to vector<8x8xf32>
    %8 = arith.addf %4, %7 : vector<8x8xf32>
    %c0_8 = arith.constant 0 : index
    %c0_9 = arith.constant 0 : index
    %c0_10 = arith.constant 0 : index
    %c0_11 = arith.constant 0 : index
    %9 = vector.load %arg6[%c0_8, %c0_9, %c0_10, %c0_11] : memref<1x1x8x8xf32, #tpu.memory_space<vmem>>, vector<1x1x8x8xf32>
    %10 = vector.shape_cast %9 : vector<1x1x8x8xf32> to vector<8x8xf32>
    %11 = vector.shape_cast %8 : vector<8x8xf32> to vector<1x1x8x8xf32>
    tpu.vector_store %arg6[%c0_8, %c0_9, %c0_10, %c0_11], %11 {strides = array<i32>} : memref<1x1x8x8xf32, #tpu.memory_space<vmem>>, vector<1x1x8x8xf32>,
    return
  }
  func.func @transform_0(%arg0: i32, %arg1: i32, %arg2: i32) -> (i32, i32, i32) {
    %c0_i32 = arith.constant 0 : i32
    %c0_i32_0 = arith.constant 0 : i32
    return %arg0, %arg1, %c0_i32 : i32, i32, i32
  }
  func.func @transform_1(%arg0: i32, %arg1: i32, %arg2: i32) -> (i32, i32, i32) {
    %c0_i32 = arith.constant 0 : i32
    %c0_i32_0 = arith.constant 0 : i32
    %c0_i32_1 = arith.constant 0 : i32
    return %arg2, %c0_i32, %c0_i32_0 : i32, i32, i32
  }
  func.func @transform_2(%arg0: i32, %arg1: i32, %arg2: i32) -> (i32, i32, i32) {
    %c0_i32 = arith.constant 0 : i32
    %c0_i32_0 = arith.constant 0 : i32
    %c0_i32_1 = arith.constant 0 : i32
    return %arg2, %c0_i32, %c0_i32_0 : i32, i32, i32
  }
  func.func @transform_3(%arg0: i32, %arg1: i32, %arg2: i32) -> (i32, i32, i32, i32) {
    %c0_i32 = arith.constant 0 : i32
    %c0_i32_0 = arith.constant 0 : i32
    return %arg0, %arg2, %arg1, %c0_i32 : i32, i32, i32, i32
  }
}

</mosaic_0001>

<bundles_post_ra>
// kernel: tpu_custom_call.1
= control target key start
LH: loop header
LB: loop body
LE: loop exit
PB: predicated region body
PF: predicated region fallthrough
CT: control target
= control target key end

     0   :  { %8 = vsyncpa [#allocation3], 0  ;;  %s798_s0 = inlined_call_operand.vmem [shape: f32[2,8,32], index: 0, kind: input, shape index: {}]   ;;  %s799_s1 = inlined_call_operand.vmem [shape: f32[4,32,8], index: 1, kind: input, shape index: {}]   ;;  %s800_s2 = inlined_call_operand.vmem [shape: f32[4,1,8], index: 2, kind: input, shape index: {}]   ;;  %s801_s3 = inlined_call_operand.hbm [shape: f32[2,4,8,8], index: 3, kind: output, shape index: {}]  }
   0x1   :  { %10 = vsyncpa [#allocation3 + $0x1], 0  ;;  %s662_s12 = smov 0   ;;  %s664_s13 = smov 0  }
   0x2   :  { %s666_s14 = smov 0   ;;  %s668_s15 = smov 0  }
   0x3   :  { %s670_s16 = smov 0   ;;  %s672_s17 = smov 0  }
   0x4   :  { %s674_s18 = smov 0   ;;  %s676_s19 = smov 0  }
   0x5 LB: > { %s439_s20 = sadd.s32 4294967295, %s637_s19   ;;  %s440_s21 = sadd.s32 4294967294, %s637_s19   ;;  %s637_s19 = sphi %s676_s19, %s16_s19   ;;  %s633_s18 = sphi %s674_s18, %s810_s18   ;;  %s629_s17 = sphi %s672_s17, %s809_s17   ;;  %s625_s16 = sphi %s670_s16, %s808_s16   ;;  %s621_s15 = sphi %s668_s15, %s807_s15   ;;  %s617_s14 = sphi %s666_s14, %s806_s14   ;;  %s613_s13 = sphi %s664_s13, %s805_s13   ;;  %s609_s12 = sphi %s662_s12, %s804_s12  }
   0x6   : > { %s28_s22 = sadd.s32 1, %s629_s17  ;;  %s35_s23 = sadd.s32 1, %s633_s18 }
   0x7   : > { %p29_p0 = scmp.ge.s32.totalorder %s28_s22, 4  ;;  %p136_p1 = scmp.ne.s32.totalorder %s617_s14, %s613_s13 }
   0x8   : > { %p137_p2 = scmp.eq.s32.totalorder %s439_s20, 7  ;;  %p142_p5 = scmp.ne.s32.totalorder %s613_s13, %s609_s12 }
   0x9   : > { %s812_s22 = smov (%p29_p0, %s28_s22), 0  ;;  %s814_s23 = smov (!%p29_p0, %s35_s23), %s633_s18 }
   0xa   : > { %s120_s24 = ssub.s32 %s629_s17, %s812_s22  ;;  %p713_p3 = por %p137_p2, %p136_p1 }
   0xb   : > { %p37_p4 = scmp.ge.s32.totalorder %s814_s23, 2  ;;  %p143_p6 = scmp.eq.s32.totalorder %s440_s21, 7 }
   0xc   : > { %p443_p7 = scmp.ge.s32.totalorder %s637_s19, 1  ;;  %p185_p9 = scmp.lt.s32.totalorder %s637_s19, 9 }
   0xd   : > { %s816_s23 = smov (%p37_p4, %s814_s23), 0  ;;  %p722_p8 = por %p143_p6, %p142_p5 }
   0xe   : > { %s119_s27 = ssub.s32 %s633_s18, %s816_s23  ;;  %s126_s28 = sadd.s32 1, %s617_s14 }
   0xf   : > { %s121_s29 = sor.u32 %s120_s24, %s119_s27  ;;  %p186_p10 = pnand %p443_p7, %p185_p9 }
  0x10   : > { %p124_p11 = scmp.eq.s32.totalorder %s121_s29, 0  ;;  %p226_p12 = scmp.lt.s32.totalorder (!%p186_p10), %s621_s15, 3 }
  0x11   : > { %189 = sbr.rel (%p186_p10) target bundleno = 242 (0xf2), region = 32  ;;  %p219_p13 = scmp.lt.s32.totalorder (!%p186_p10), %s625_s16, 1 }
  0x12   : > { %s731_s30 = scalar_select %p124_p11, %s617_s14, %s126_s28  }
  0x13   : > { %s216_s24 = sand.u32 (!%p186_p10), 1, %s613_s13   ;;  %s451_s28 = sshll.u32 (!%p186_p10), %s625_s16, 2 }
  0x14   : > { %s444_s27 = sshll.u32 (!%p186_p10), %s216_s24, 3  ;;  %s335_s7 = sadd.s32 (!%p186_p10), %s621_s15, %s451_s28 }
  0x15   : > { %s452_s8 = sshll.u32 (!%p186_p10), %s335_s7, 7 }
  0x16   : > { %v639_v0 = vmov 0.0   ;;  %vm640_vm0 = vmmov 0   ;;  %s227_s4 = scalar_select %p226_p12, %s621_s15, 3  ;;  %vm246_vm1 = vcmask 261120   ;;  %vm320_vm2 = vcmask 64512  }
  0x17   : > { %461 = vmatprep.subr.mxu0 %v639_v0  ;;  %469 = vmatprep.mubr.msk.f32.mxu0 %vm640_vm0, %v639_v0  ;;  %s220_s5 = scalar_select %p219_p13, %s625_s16, 1 }
  0x18   : > { %s455_s6 = sshll.u32 %s227_s4, 5  ;;  %s323_s16 = scalar_lea.sflag [#allocation3], %s216_s24 }
  0x19   : > { %s230_s9 = scalar_lea.vmem %s799_s1, %s455_s6  ;;  %s445_s10 = sshll.u32 %s220_s5, 3 }
  0x1a   : > { %v238_v1 = vld [vmem:[%s230_s9 + $0x18] sm:$0xff]  ;;  %v237_v2 = vld [vmem:[%s230_s9 + $0x10] sm:$0xff]  ;;  %v236_v3 = vld [vmem:[%s230_s9 + $0x8] sm:$0xff]  ;;  %s225_s21 = scalar_lea.vmem %s798_s0, %s445_s10  ;;  %s233_s6 = scalar_lea.vmem %s800_s2, %s227_s4 }
  0x1b   : > { %462 = vmatpush3.msra.mxu0 %v238_v1  ;;  %v235_v4 = vld [vmem:[%s230_s9] sm:$0xff]  ;;  %s218_s10 = scalar_lea.vmem [#allocation2], %s444_s27  ;;  %s641_s15 = smov [#allocation2]  }
  0x1c   : > { %463 = vmatprep.subr.mxu0 %v639_v0  ;;  %v234_v5 = vld [vmem:[%s225_s21] sm:$0xff]  ;;  %s339_s11 = sshll.u32 %s218_s10, 4  ;;  %s752_s21 = scalar_lea.hbm %s801_s3, %s452_s8  ;;  %s340_s11 = int_to_ptr.vmem [resolvable:$true] %s339_s11 }
  0x1d   : > { %464 = vmatpush3.msra.mxu0 %v237_v2  ;;  %v448_v6 = vld [vmem:[%s233_s6] ss:$0 sm:$0xff]  ;;  %s545_s29 = scalar_lea.vmem %s340_s11, 128  ;;  %s549_s4 = sshll.u32 %s641_s15, 4  ;;  %s550_s4 = int_to_ptr.vmem [resolvable:$false] %s549_s4 }
  0x1e   : > { %465 = vmatprep.subr.mxu0 %v639_v0  ;;  %p546_p0 = scmp.ne.s32.totalorder %s340_s11, %s545_s29  ;;  %s551_s27 = scalar_lea.vmem %s550_s4, 256 }
  0x1f   : > { %466 = vmatpush3.msra.mxu0 %v236_v3  ;;  %p552_p4 = scmp.lt.s32.totalorder %s340_s11, %s550_s4  ;;  %p553_p5 = scmp.lt.s32.totalorder %s551_s27, %s545_s29 }
  0x20   : > { %467 = vmatprep.subr.mxu0 %v639_v0  ;;  %p547_p1 = pnand %p546_p0, %p713_p3 }
  0x21   : > { %468 = vmatpush3.msra.mxu0 %v235_v4  ;;  %p554_p6 = por %p553_p5, %p552_p4 }
  0x22   : > { %470 = vmatmul.mubr.msk.f32.vlgmr.msra.gmra.mxu0 %vm246_vm1, %v234_v5  ;;  %p548_p2 = pneg %p547_p1 }
  0x24   : > { %p555_p7 = pnand %p554_p6, %p548_p2 }
  0xe2   : > { %v316_v7 = vpop.f32.mrf.mxu0 }
  0xe3   : > { %v317_v8 = vadd.f32 %v448_v6, %v316_v7 }
  0xe4   : > { %v471_v9 = vpop.f32.mrf.mxu0 }
  0xe5   : > { %321 = vst.msk [vmem:[%s218_s10] sm:$0xff] %vm320_vm2, %v317_v8 }
  0xe6   : > { %558 = shalt.err (!%p555_p7)
}
  0xe7   : > { %s559_s28 = scalar_lea.hbm %s752_s21, 128  ;;  %s563_s6 = scalar_lea.hbm %s801_s3, 1024 }
  0xe8   : > { %p560_p9 = scmp.ne.s32.totalorder %s752_s21, %s559_s28  ;;  %p564_p12 = scmp.lt.s32.totalorder %s752_s21, %s801_s3 }
  0xe9   : > { %p565_p13 = scmp.lt.s32.totalorder %s563_s6, %s559_s28 }
  0xea   : > { %p561_p10 = pnand %p560_p9, %p713_p3 }
  0xeb   : > { %p566_p0 = por %p565_p13, %p564_p12 }
  0xec   : > { %p562_p11 = pneg %p561_p10 }
  0xee   : > { %p567_p1 = pnand %p566_p0, %p562_p11 }
  0xf0   : > { %570 = shalt.err (!%p567_p1)
}
  0xf1   : > { %472 = dma.vmem_to_hbm [thread:$0]  (%p713_p3), %s340_s11, 128, %s752_s21, %s323_s16  }
  0xf2 PF: > { %p478_p2 = scmp.ge.s32.totalorder %s637_s19, 2  ;;  %s351_s10 = sand.u32 1, %s609_s12  }
  0xf3   : > { %s352_s9 = scalar_lea.sflag [#allocation3], %s351_s10 }
  0xf4   : > { %p475_p4 = pnand %p478_p2, %p722_p8 }
  0xf6   : > { %p476_p5 = pneg %p475_p4 }
  0xf8   : > { %604 = dma.done.wait (%p476_p5), %s352_s9, 128  }
  0xf9   : > { %606 = vsyncadd (%p476_p5), %s352_s9, 4294967168  ;;  %s16_s19 = sadd.s32 1, %s637_s19   ;;  %s804_s12 = smov %s613_s13 }
  0xfa   : > { %p13_p6 = scmp.ge.s32.totalorder %s16_s19, 10   ;;  %s805_s13 = smov %s617_s14 }
  0xfb   : > { %s806_s14 = smov %s731_s30  ;;  %s807_s15 = smov %s629_s17 }
  0xfc   : > { %s808_s16 = smov %s633_s18  ;;  %s809_s17 = smov %s812_s22 }
  0xfd   : > { %s810_s18 = smov %s816_s23  ;;  %15 = sbr.rel (!%p13_p6) target bundleno = 5 (0x5), region = 73 }
 0x102   :  { %357 = vsyncpa [#allocation3], 1 }
 0x103   :  { %359 = vsyncpa [#allocation3 + $0x1], 1 }

</bundles_post_ra>
